<compile_context>
chip_gen: v5e
topology: v5e:2x2
jax: 0.10.0
libtpu: 0.0.40
codegen_flags: <defaults>
</compile_context>

<pallas_src>
import jax
import jax.numpy as jnp
from jax.experimental import pallas as pl
from jax.experimental.pallas import tpu as pltpu


# ----------------------------------------------------------------------------
# 1) Preferred form: identity costs nothing.
# ----------------------------------------------------------------------------
def transparent_layer(x: jax.Array) -> jax.Array:
    """Exact equivalent of TransparentLayer.forward: return x unchanged."""
    return x


# ----------------------------------------------------------------------------
# 2) Pallas passthrough with no kernel-side DMA (aliased output buffer).
#    For a true zero-copy alias, call under jax.jit(..., donate_argnums=0);
#    otherwise XLA adds one defensive HBM copy before the aliased call.
# ----------------------------------------------------------------------------
def _alias_passthrough_kernel(x_ref, o_ref):
    # Intentionally empty: input_output_aliases={0: 0} makes the output buffer
    # the same HBM buffer as the input.  Nothing to load, compute, or store.
    del x_ref, o_ref


def transparent_layer_pallas(x: jax.Array) -> jax.Array:
    """Identity through a pallas_call boundary with zero kernel-side DMA."""
    return pl.pallas_call(
        _alias_passthrough_kernel,
        out_shape=jax.ShapeDtypeStruct(x.shape, x.dtype),
        in_specs=[pl.BlockSpec(memory_space=pl.ANY)],   # stay in HBM, no auto-DMA
        out_specs=pl.BlockSpec(memory_space=pl.ANY),
        input_output_aliases={0: 0},
    )(x)


# ----------------------------------------------------------------------------
# 3) Materializing copy: single direct HBM -> HBM DMA, no VMEM bounce.
# ----------------------------------------------------------------------------
def _hbm_to_hbm_copy_kernel(x_hbm_ref, o_hbm_ref, sem):
    cp = pltpu.make_async_copy(x_hbm_ref, o_hbm_ref, sem)
    cp.start()
    cp.wait()


def transparent_layer_copy(x: jax.Array) -> jax.Array:
    """Identity as one HBM->HBM DMA copy (fresh output buffer)."""
    nbytes = x.size * jnp.dtype(x.dtype).itemsize
    return pl.pallas_call(
        _hbm_to_hbm_copy_kernel,
        out_shape=jax.ShapeDtypeStruct(x.shape, x.dtype),
        in_specs=[pl.BlockSpec(memory_space=pl.ANY)],
        out_specs=pl.BlockSpec(memory_space=pl.ANY),
        scratch_shapes=[pltpu.SemaphoreType.DMA],
        cost_estimate=pl.CostEstimate(
            flops=0, transcendentals=0, bytes_accessed=2 * nbytes),
    )(x)


# ----------------------------------------------------------------------------
# 4) Optional: classic pipelined VMEM copy (dtype-aware, lane-dense blocks).
# ----------------------------------------------------------------------------
def _vmem_copy_kernel(x_ref, o_ref):
    o_ref[...] = x_ref[...]


def _pick_lane_width(total: int):
    for k in (8192, 4096, 2048, 1024, 512, 256, 128):
        if total % k == 0:
            return k
    return None


def _pick_row_tile(rows: int, lanes: int, itemsize: int, target_bytes: int) -> int:
    """Largest multiple-of-8 row tile <= target_bytes, preferring divisors of rows."""
    max_tr = max(8, target_bytes // (lanes * itemsize))
    if rows <= max_tr:
        return rows
    cand = (min(max_tr, rows) // 8) * 8
    while cand >= 8:
        if rows % cand == 0:          # even divisor -> every store unmasked
            return cand
        cand -= 8
    return (min(max_tr, rows) // 8) * 8 or rows  # ragged last block (masked, correct)


def transparent_layer_copy_tiled(
    x: jax.Array, target_block_bytes: int = 4 * 1024 * 1024
) -> jax.Array:
    """Identity as a tiled HBM->VMEM->HBM copy (kept for reference / A-B tests)."""
    orig_shape = x.shape
    total = x.size
    lanes = _pick_lane_width(total)
    if lanes is None or total == 0:
        # Element count not a multiple of 128 (or empty): use the direct
        # HBM->HBM DMA instead of a full-array VMEM block.
        return transparent_layer_copy(x)

    itemsize = jnp.dtype(x.dtype).itemsize
    rows = total // lanes
    tr = _pick_row_tile(rows, lanes, itemsize, target_block_bytes)
    x2d = x.reshape(rows, lanes)
    grid = (pl.cdiv(rows, tr),)
    nbytes = total * itemsize

    y2d = pl.pallas_call(
        _vmem_copy_kernel,
        out_shape=jax.ShapeDtypeStruct((rows, lanes), x.dtype),
        grid=grid,
        in_specs=[pl.BlockSpec((tr, lanes), lambda i: (i, 0))],
        out_specs=pl.BlockSpec((tr, lanes), lambda i: (i, 0)),
        compiler_params=pltpu.CompilerParams(
            dimension_semantics=("parallel",),          # shards grid on v7x's 2 TCs
            vmem_limit_bytes=48 * 1024 * 1024,          # 4 live ~4MiB buffers + headroom
        ),
        cost_estimate=pl.CostEstimate(
            flops=0, transcendentals=0, bytes_accessed=2 * nbytes),
    )(x2d)
    return y2d.reshape(orig_shape)


if __name__ == "__main__":
    key = jax.random.PRNGKey(0)
    k0, k1 = jax.random.split(key)
    x = jax.random.normal(k0, (2, 4, 16, 16), dtype=jnp.float32)

    y_direct = transparent_layer(x)
    y_alias = transparent_layer_pallas(x)
    y_dma = transparent_layer_copy(x)
    y_tiled = transparent_layer_copy_tiled(x)

    # Odd element count (not a multiple of 128) -> exercises the fixed fallback.
    x_odd = jax.random.normal(k1, (3, 5, 7), dtype=jnp.float32)
    y_odd = transparent_layer_copy_tiled(x_odd)

    jax.block_until_ready((y_direct, y_alias, y_dma, y_tiled, y_odd))

    for y in (y_direct, y_alias, y_dma, y_tiled):
        assert y.shape == x.shape and y.dtype == x.dtype
        assert bool(jnp.array_equal(y, x))
    assert y_odd.shape == x_odd.shape and bool(jnp.array_equal(y_odd, x_odd))

    print("KERNEL_OK")
</pallas_src>

<mosaic_0001>
module attributes {stable_mosaic.version = 11 : i64} {
  func.func @_alias_passthrough_kernel(%arg0: memref<2x4x16x16xf32, #tpu.memory_space<any>>, %arg1: memref<2x4x16x16xf32, #tpu.memory_space<any>>) attributes {dimension_semantics = [], scalar_prefetch = 0 : i64, scratch_operands = 0 : i64, tpu.core_type = #tpu.core_type<tc>} {
    return
  }
}

</mosaic_0001>

<bundles_post_ra>
// kernel: tpu_custom_call.1
= control target key start
LH: loop header
LB: loop body
LE: loop exit
PB: predicated region body
PF: predicated region fallthrough
CT: control target
= control target key end

     0   :  { %s16_s0 = inlined_call_operand.hbm [shape: f32[2,4,16,16], index: 0, kind: input, shape index: {}, may-alias: {0,1}]   ;;  %s17_s1 = inlined_call_operand.hbm [shape: f32[2,4,16,16], index: 1, kind: output, shape index: {}, may-alias: {0,1}]  }

</bundles_post_ra>
